<compile_context>
chip_gen: v7x
topology: tpu7x:2x2x1
jax: 0.10.0
libtpu: 0.0.40
codegen_flags: <defaults>
</compile_context>

<pallas_src>
import jax
import jax.numpy as jnp
from jax.experimental import pallas as pl
from jax.experimental.pallas import tpu as pltpu

NUM_HIDDEN = 3
IN_DIM = 16
HIDDEN_SIZES = [50, 20, 20]   # [50] + [20] * (num_hidden - 1)
OUT_DIM = 1                   # binary MLPClassifier head

ROW_TILE_MAX = 8192           # rows per grid step (upper bound)
VMEM_LIMIT_BYTES = 48 * 1024 * 1024

_NT_DIMS = (((1,), (1,)), ((), ()))   # contract last dims of both operands


def _round_up(n, m):
    return ((n + m - 1) // m) * m


def _pick_row_tile(n):
    """Rows per grid step.

    * n <= 512: one full-array block (block dims == array dims, always legal).
    * larger n: a big multiple-of-256 tile to amortize per-step overhead,
      capped so there are always >= 2 grid steps (v7x megacore sharding) and
      at ROW_TILE_MAX (VMEM budget incl. lane-padded x double buffers).
    """
    if n <= 512:
        return n
    half = _round_up((n + 1) // 2, 256)
    return max(256, min(ROW_TILE_MAX, half))


def _sklearn_nn_kernel(x_ref,
                       w0_ref, b0_ref,
                       w1_ref, b1_ref,
                       w2_ref, b2_ref,
                       wh_ref, bh_ref,
                       out_ref):
    """One (tile, 16) row-block through the whole MLP, transposed orientation.

    x_ref  : (tile, 16) float32   (native dtype; cast to bf16 here)
    wK_ref : (outK, inK) bfloat16 (native PyTorch Linear layout)
    bK_ref : (outK, 1)  float32
    wh_ref : (2, 20)    bfloat16  rows = [-w_last, +w_last]
    bh_ref : (2, 1)     float32   rows = [-b_last, +b_last]
    out_ref: (2, tile)  float32   rows = [sigmoid(-z), sigmoid(z)]  (lane-dense)
    """
    x = x_ref[...].astype(jnp.bfloat16)

    # layer 0: (50,16) x (tile,16)^T -> (50, tile)   [NT dot: rows -> lanes]
    h = jax.lax.dot_general(w0_ref[...], x, _NT_DIMS,
                            preferred_element_type=jnp.float32)
    h = jnp.maximum(h + b0_ref[...], 0.0)

    # layer 1: (20,50) @ (50,tile) -> (20, tile)
    h = jnp.dot(w1_ref[...], h.astype(jnp.bfloat16),
                preferred_element_type=jnp.float32)
    h = jnp.maximum(h + b1_ref[...], 0.0)

    # layer 2: (20,20) @ (20,tile) -> (20, tile)
    h = jnp.dot(w2_ref[...], h.astype(jnp.bfloat16),
                preferred_element_type=jnp.float32)
    h = jnp.maximum(h + b2_ref[...], 0.0)

    # fused +/- head: (2,20) @ (20,tile) + bias; one sigmoid gives both
    # torch.hstack columns [sigmoid(-z), sigmoid(z)] as lane-dense rows.
    z = jnp.dot(wh_ref[...], h.astype(jnp.bfloat16),
                preferred_element_type=jnp.float32) + bh_ref[...]
    out_ref[...] = jax.nn.sigmoid(z).astype(out_ref.dtype)


def init_params(key, in_dim=IN_DIM, hidden_sizes=HIDDEN_SIZES, out_dim=OUT_DIM):
    """Deterministic synthetic parameters, PyTorch Linear convention: W is (out, in)."""
    dims = [in_dim] + list(hidden_sizes) + [out_dim]
    params = []
    for i in range(len(dims) - 1):
        fan_in, fan_out = dims[i], dims[i + 1]
        key, kw, kb = jax.random.split(key, 3)
        bound = 1.0 / jnp.sqrt(jnp.float32(fan_in))
        w = jax.random.uniform(kw, (fan_out, fan_in), jnp.float32, -bound, bound)
        b = jax.random.uniform(kb, (fan_out,), jnp.float32, -bound, bound)
        params.append((w, b))
    return params


def pack_params(params):
    """One-time packing outside the per-call hot path.

    Hidden layers -> (W as (out, in) bf16, b as (out, 1) f32).
    Output layer  -> (2, 20) head rows [-w, +w] and (2, 1) bias [-b, +b] so
                     sigmoid(head @ h + bias) == [sigmoid(-z); sigmoid(z)].
    """
    packed = []
    for w, b in params[:-1]:
        packed.append(jnp.asarray(w, jnp.float32).astype(jnp.bfloat16))   # (out, in)
        packed.append(jnp.asarray(b, jnp.float32).reshape(-1, 1))         # (out, 1)
    w_last, b_last = params[-1]                       # (1, 20), (1,)
    wl = jnp.asarray(w_last, jnp.float32)
    packed.append(jnp.concatenate([-wl, wl], axis=0).astype(jnp.bfloat16))  # (2, 20)
    bl = jnp.asarray(b_last, jnp.float32).reshape(1, 1)
    packed.append(jnp.concatenate([-bl, bl], axis=0))                       # (2, 1)
    return packed


@jax.jit
def sklearn_nn_forward(x, packed):
    """Pallas-backed forward. x: (..., D) -> (N, 2) float32 probabilities."""
    d = x.shape[-1]
    x2 = x.reshape(-1, d)                 # native dtype; no wrapper cast / pad
    n = x2.shape[0]

    tile = _pick_row_tile(n)
    grid = (pl.cdiv(n, tile),)            # ragged last block masked by Pallas

    x_spec = pl.BlockSpec((tile, d), lambda i: (i, 0))
    # Parameters stay VMEM-resident: constant block index -> fetched once.
    param_specs = [pl.BlockSpec(p.shape, lambda i: (0, 0)) for p in packed]
    out_spec = pl.BlockSpec((2, tile), lambda i: (0, i))

    flops = 2 * n * (IN_DIM * 50 + 50 * 20 + 20 * 20 + 20 * 2)
    bytes_accessed = (n * (d * 4 + 2 * 4)
                      + sum(p.size * p.dtype.itemsize for p in packed))
    cost = pl.CostEstimate(flops=flops,
                           transcendentals=2 * n,
                           bytes_accessed=bytes_accessed)

    out_t = pl.pallas_call(
        _sklearn_nn_kernel,
        out_shape=jax.ShapeDtypeStruct((2, n), jnp.float32),
        grid_spec=pltpu.PrefetchScalarGridSpec(
            num_scalar_prefetch=0,
            grid=grid,
            in_specs=[x_spec] + param_specs,
            out_specs=out_spec,
        ),
        compiler_params=pltpu.CompilerParams(
            dimension_semantics=("parallel",),
            vmem_limit_bytes=VMEM_LIMIT_BYTES),
        cost_estimate=cost,
    )(x2, *packed)

    # (2, N) -> (N, 2): tiny wrapper-side transpose keeps the kernel's store
    # lane-dense (the biggest measured Pallas store lever).
    return out_t.T


def _reference_forward(x, params):
    """Plain-JAX float32 reference for verification."""
    d = x.shape[-1]
    h = x.reshape(-1, d).astype(jnp.float32)
    for i, (w, b) in enumerate(params):
        z = h @ w.T + b
        if i < len(params) - 1:
            h = jnp.maximum(z, 0.0)
        else:
            return jnp.concatenate(
                [jax.nn.sigmoid(-z), jax.nn.sigmoid(z)], axis=-1)


if __name__ == "__main__":
    key = jax.random.PRNGKey(0)
    kp, kx, kx2 = jax.random.split(key, 3)

    params = init_params(kp)
    packed = pack_params(params)

    # Small input consistent with the module: (batch=2, groups=4, features=16)
    # -> flattened to (8, 16) rows.
    x = jax.random.normal(kx, (2, 4, IN_DIM), jnp.float32)

    out = sklearn_nn_forward(x, packed)
    out = jax.block_until_ready(out)

    ref = _reference_forward(x, params)
    assert out.shape == (8, 2), out.shape
    # bf16-streamed matmuls vs the pure-f32 reference: allow bf16-level error.
    max_err = float(jnp.max(jnp.abs(out - ref)))
    assert max_err < 3e-2, f"mismatch vs reference: max abs err {max_err}"
    # the two columns are sigmoid(-z) and sigmoid(z): they must sum to ~1.
    assert float(jnp.max(jnp.abs(out.sum(-1) - 1.0))) < 3e-2

    # Larger ragged N (not a multiple of 8 or of the tile) to exercise the
    # multi-step grid and the masked last-block path with no wrapper padding.
    xl = jax.random.normal(kx2, (2500, IN_DIM), jnp.float32)
    out_l = jax.block_until_ready(sklearn_nn_forward(xl, packed))
    ref_l = _reference_forward(xl, params)
    assert out_l.shape == (2500, 2), out_l.shape
    max_err_l = float(jnp.max(jnp.abs(out_l - ref_l)))
    assert max_err_l < 3e-2, f"mismatch (large) vs reference: {max_err_l}"

    print("KERNEL_OK")
</pallas_src>

<mosaic_0001>
module attributes {stable_mosaic.version = 11 : i64} {
  func.func @_sklearn_nn_kernel(%arg0: i32, %arg1: memref<8x16xf32, #tpu.memory_space<vmem>>, %arg2: memref<50x16xbf16, #tpu.memory_space<vmem>>, %arg3: memref<50x1xf32, #tpu.memory_space<vmem>>, %arg4: memref<20x50xbf16, #tpu.memory_space<vmem>>, %arg5: memref<20x1xf32, #tpu.memory_space<vmem>>, %arg6: memref<20x20xbf16, #tpu.memory_space<vmem>>, %arg7: memref<20x1xf32, #tpu.memory_space<vmem>>, %arg8: memref<2x20xbf16, #tpu.memory_space<vmem>>, %arg9: memref<2x1xf32, #tpu.memory_space<vmem>>, %arg10: memref<2x8xf32, #tpu.memory_space<vmem>>) attributes {dimension_semantics = [#tpu.dimension_semantics<parallel>], iteration_bounds = array<i64: 1>, scalar_prefetch = 0 : i64, scratch_operands = 0 : i64, tpu.core_type = #tpu.core_type<tc>, window_params = [{transform_indices = @transform_0, window_bounds = array<i64: 8, 16>}, {pipeline_mode = #tpu.pipeline_mode<synchronous>, transform_indices = @transform_1, window_bounds = array<i64: 50, 16>}, {pipeline_mode = #tpu.pipeline_mode<synchronous>, transform_indices = @transform_2, window_bounds = array<i64: 50, 1>}, {pipeline_mode = #tpu.pipeline_mode<synchronous>, transform_indices = @transform_3, window_bounds = array<i64: 20, 50>}, {pipeline_mode = #tpu.pipeline_mode<synchronous>, transform_indices = @transform_4, window_bounds = array<i64: 20, 1>}, {pipeline_mode = #tpu.pipeline_mode<synchronous>, transform_indices = @transform_5, window_bounds = array<i64: 20, 20>}, {pipeline_mode = #tpu.pipeline_mode<synchronous>, transform_indices = @transform_6, window_bounds = array<i64: 20, 1>}, {pipeline_mode = #tpu.pipeline_mode<synchronous>, transform_indices = @transform_7, window_bounds = array<i64: 2, 20>}, {pipeline_mode = #tpu.pipeline_mode<synchronous>, transform_indices = @transform_8, window_bounds = array<i64: 2, 1>}, {transform_indices = @transform_9, window_bounds = array<i64: 2, 8>}]} {
    %c0 = arith.constant 0 : index
    %c0_0 = arith.constant 0 : index
    %0 = vector.load %arg1[%c0, %c0_0] : memref<8x16xf32, #tpu.memory_space<vmem>>, vector<8x16xf32>
    %1 = arith.truncf %0 : vector<8x16xf32> to vector<8x16xbf16>
    %c0_1 = arith.constant 0 : index
    %c0_2 = arith.constant 0 : index
    %2 = vector.load %arg2[%c0_1, %c0_2] : memref<50x16xbf16, #tpu.memory_space<vmem>>, vector<50x16xbf16>
    %cst = arith.constant dense<0.000000e+00> : vector<50x8xf32>
    %3 = tpu.matmul %2, %1, %cst {dimension_numbers = #tpu.dot_dimension_numbers<[1], [1], [0], [0], [0, 0, 1, 0], [], []>} : vector<50x16xbf16>, vector<8x16xbf16>, vector<50x8xf32> -> vector<50x8xf32>
    %c0_3 = arith.constant 0 : index
    %c0_4 = arith.constant 0 : index
    %4 = vector.load %arg3[%c0_3, %c0_4] : memref<50x1xf32, #tpu.memory_space<vmem>>, vector<50x1xf32>
    %5 = vector.broadcast %4 : vector<50x1xf32> to vector<50x8xf32>
    %6 = arith.addf %3, %5 : vector<50x8xf32>
    %cst_5 = arith.constant 0.000000e+00 : f32
    %7 = vector.broadcast %cst_5 : f32 to vector<50x8xf32>
    %8 = arith.maximumf %6, %7 : vector<50x8xf32>
    %c0_6 = arith.constant 0 : index
    %c0_7 = arith.constant 0 : index
    %9 = vector.load %arg4[%c0_6, %c0_7] : memref<20x50xbf16, #tpu.memory_space<vmem>>, vector<20x50xbf16>
    %10 = arith.truncf %8 : vector<50x8xf32> to vector<50x8xbf16>
    %cst_8 = arith.constant dense<0.000000e+00> : vector<20x8xf32>
    %11 = tpu.matmul %9, %10, %cst_8 {dimension_numbers = #tpu.dot_dimension_numbers<[1], [0], [0], [1], [0, 0, 1, 1], [], []>} : vector<20x50xbf16>, vector<50x8xbf16>, vector<20x8xf32> -> vector<20x8xf32>
    %c0_9 = arith.constant 0 : index
    %c0_10 = arith.constant 0 : index
    %12 = vector.load %arg5[%c0_9, %c0_10] : memref<20x1xf32, #tpu.memory_space<vmem>>, vector<20x1xf32>
    %13 = vector.broadcast %12 : vector<20x1xf32> to vector<20x8xf32>
    %14 = arith.addf %11, %13 : vector<20x8xf32>
    %cst_11 = arith.constant 0.000000e+00 : f32
    %15 = vector.broadcast %cst_11 : f32 to vector<20x8xf32>
    %16 = arith.maximumf %14, %15 : vector<20x8xf32>
    %c0_12 = arith.constant 0 : index
    %c0_13 = arith.constant 0 : index
    %17 = vector.load %arg6[%c0_12, %c0_13] : memref<20x20xbf16, #tpu.memory_space<vmem>>, vector<20x20xbf16>
    %18 = arith.truncf %16 : vector<20x8xf32> to vector<20x8xbf16>
    %cst_14 = arith.constant dense<0.000000e+00> : vector<20x8xf32>
    %19 = tpu.matmul %17, %18, %cst_14 {dimension_numbers = #tpu.dot_dimension_numbers<[1], [0], [0], [1], [0, 0, 1, 1], [], []>} : vector<20x20xbf16>, vector<20x8xbf16>, vector<20x8xf32> -> vector<20x8xf32>
    %c0_15 = arith.constant 0 : index
    %c0_16 = arith.constant 0 : index
    %20 = vector.load %arg7[%c0_15, %c0_16] : memref<20x1xf32, #tpu.memory_space<vmem>>, vector<20x1xf32>
    %21 = vector.broadcast %20 : vector<20x1xf32> to vector<20x8xf32>
    %22 = arith.addf %19, %21 : vector<20x8xf32>
    %cst_17 = arith.constant 0.000000e+00 : f32
    %23 = vector.broadcast %cst_17 : f32 to vector<20x8xf32>
    %24 = arith.maximumf %22, %23 : vector<20x8xf32>
    %c0_18 = arith.constant 0 : index
    %c0_19 = arith.constant 0 : index
    %25 = vector.load %arg8[%c0_18, %c0_19] : memref<2x20xbf16, #tpu.memory_space<vmem>>, vector<2x20xbf16>
    %26 = arith.truncf %24 : vector<20x8xf32> to vector<20x8xbf16>
    %cst_20 = arith.constant dense<0.000000e+00> : vector<2x8xf32>
    %27 = tpu.matmul %25, %26, %cst_20 {dimension_numbers = #tpu.dot_dimension_numbers<[1], [0], [0], [1], [0, 0, 1, 1], [], []>} : vector<2x20xbf16>, vector<20x8xbf16>, vector<2x8xf32> -> vector<2x8xf32>
    %c0_21 = arith.constant 0 : index
    %c0_22 = arith.constant 0 : index
    %28 = vector.load %arg9[%c0_21, %c0_22] : memref<2x1xf32, #tpu.memory_space<vmem>>, vector<2x1xf32>
    %29 = vector.broadcast %28 : vector<2x1xf32> to vector<2x8xf32>
    %30 = arith.addf %27, %29 : vector<2x8xf32>
    %31 = arith.negf %30 : vector<2x8xf32>
    %32 = math.exp %31 : vector<2x8xf32>
    %cst_23 = arith.constant 1.000000e+00 : f32
    %33 = vector.broadcast %cst_23 : f32 to vector<2x8xf32>
    %34 = arith.addf %33, %32 : vector<2x8xf32>
    %35 = arith.divf %33, %34 : vector<2x8xf32>
    %c0_24 = arith.constant 0 : index
    %c0_25 = arith.constant 0 : index
    %36 = vector.load %arg10[%c0_24, %c0_25] : memref<2x8xf32, #tpu.memory_space<vmem>>, vector<2x8xf32>
    tpu.vector_store %arg10[%c0_24, %c0_25], %35 {strides = array<i32>} : memref<2x8xf32, #tpu.memory_space<vmem>>, vector<2x8xf32>,
    return
  }
  func.func @transform_0(%arg0: i32) -> (i32, i32) {
    %c0_i32 = arith.constant 0 : i32
    %c0_i32_0 = arith.constant 0 : i32
    return %arg0, %c0_i32 : i32, i32
  }
  func.func @transform_1(%arg0: i32) -> (i32, i32) {
    %c0_i32 = arith.constant 0 : i32
    %c0_i32_0 = arith.constant 0 : i32
    %c0_i32_1 = arith.constant 0 : i32
    return %c0_i32, %c0_i32_0 : i32, i32
  }
  func.func @transform_2(%arg0: i32) -> (i32, i32) {
    %c0_i32 = arith.constant 0 : i32
    %c0_i32_0 = arith.constant 0 : i32
    %c0_i32_1 = arith.constant 0 : i32
    return %c0_i32, %c0_i32_0 : i32, i32
  }
  func.func @transform_3(%arg0: i32) -> (i32, i32) {
    %c0_i32 = arith.constant 0 : i32
    %c0_i32_0 = arith.constant 0 : i32
    %c0_i32_1 = arith.constant 0 : i32
    return %c0_i32, %c0_i32_0 : i32, i32
  }
  func.func @transform_4(%arg0: i32) -> (i32, i32) {
    %c0_i32 = arith.constant 0 : i32
    %c0_i32_0 = arith.constant 0 : i32
    %c0_i32_1 = arith.constant 0 : i32
    return %c0_i32, %c0_i32_0 : i32, i32
  }
  func.func @transform_5(%arg0: i32) -> (i32, i32) {
    %c0_i32 = arith.constant 0 : i32
    %c0_i32_0 = arith.constant 0 : i32
    %c0_i32_1 = arith.constant 0 : i32
    return %c0_i32, %c0_i32_0 : i32, i32
  }
  func.func @transform_6(%arg0: i32) -> (i32, i32) {
    %c0_i32 = arith.constant 0 : i32
    %c0_i32_0 = arith.constant 0 : i32
    %c0_i32_1 = arith.constant 0 : i32
    return %c0_i32, %c0_i32_0 : i32, i32
  }
  func.func @transform_7(%arg0: i32) -> (i32, i32) {
    %c0_i32 = arith.constant 0 : i32
    %c0_i32_0 = arith.constant 0 : i32
    %c0_i32_1 = arith.constant 0 : i32
    return %c0_i32, %c0_i32_0 : i32, i32
  }
  func.func @transform_8(%arg0: i32) -> (i32, i32) {
    %c0_i32 = arith.constant 0 : i32
    %c0_i32_0 = arith.constant 0 : i32
    %c0_i32_1 = arith.constant 0 : i32
    return %c0_i32, %c0_i32_0 : i32, i32
  }
  func.func @transform_9(%arg0: i32) -> (i32, i32) {
    %c0_i32 = arith.constant 0 : i32
    %c0_i32_0 = arith.constant 0 : i32
    return %c0_i32, %arg0 : i32, i32
  }
}

</mosaic_0001>

<bundles_post_ra>
// kernel: sklearn_nn_forward.1
= control target key start
LH: loop header
LB: loop body
LE: loop exit
PB: predicated region body
PF: predicated region fallthrough
CT: control target
= control target key end

     0   :  { %vm103_vm0 = vcmask 130048   ;;  %v574_v3 = vmov 0   ;;  %s726_s0 = inlined_call_operand.vmem [shape: f32[8,16], index: 0, kind: input, shape index: {}]   ;;  %s727_s1 = inlined_call_operand.vmem [shape: bf16[50,16], index: 1, kind: input, shape index: {}]   ;;  %s728_s2 = inlined_call_operand.vmem [shape: f32[50,1], index: 2, kind: input, shape index: {}]   ;;  %s729_s3 = inlined_call_operand.vmem [shape: bf16[20,50], index: 3, kind: input, shape index: {}]   ;;  %s730_s4 = inlined_call_operand.vmem [shape: f32[20,1], index: 4, kind: input, shape index: {}]   ;;  %s731_s5 = inlined_call_operand.vmem [shape: bf16[20,20], index: 5, kind: input, shape index: {}]   ;;  %s732_s6 = inlined_call_operand.vmem [shape: f32[20,1], index: 6, kind: input, shape index: {}]   ;;  %s733_s7 = inlined_call_operand.vmem [shape: bf16[2,20], index: 7, kind: input, shape index: {}]   ;;  %s734_s8 = inlined_call_operand.vmem [shape: f32[2,1], index: 8, kind: input, shape index: {}]   ;;  %s735_s9 = inlined_call_operand.hbm [shape: f32[2,8], index: 9, kind: output, shape index: {}]  }
   0x1   :  { %v34_v0 = vld [vmem:[%s726_s0] sm:$0xff]  ;;  %536 = vset.pattern.permute.xlu0 %v574_v3  ;;  %537 = vset.pattern.permute.xlu1 %v574_v3  ;;  %v45_v6 = vld [vmem:[%s728_s2 + $0x10] sm:$0xff]  ;;  %v44_v7 = vld [vmem:[%s728_s2 + $0x8] sm:$0xff] }
   0x2   :  { %v35_v1 = vpack.c.bf16 %v34_v0, %v34_v0  ;;  %v538_v2 = vld [vmem:[%s727_s1] sm:$0xff]   ;;  %62 = vperm.xlu1 %537, %v45_v6   ;;  %v46_v8 = vld [vmem:[%s728_s2 + $0x18] sm:$0xff]  ;;  %v539_v9 = vld [vmem:[%s727_s1 + $0x8] sm:$0xff]  }
   0x3   :  { %493 = vmatprep.mubr.msk.bf16.mxu0 %vm103_vm0, %v538_v2  ;;  %v43_v5 = vld [vmem:[%s728_s2] sm:$0xff]  ;;  %v540_v10 = vld [vmem:[%s727_s1 + $0x10] sm:$0xff]   ;;  %v48_v12 = vld [vmem:[%s728_s2 + $0x28] sm:$0xff] }
   0x4   :  { %529 = vmatprep.subr.msk.bf16.mxu0 %vm103_vm0, %v35_v1  ;;  %v117_v4 = vsel %vm103_vm0, %v35_v1, 0  ;;  %52 = vperm.xlu0 %536, %v43_v5   ;;  %v47_v11 = vld [vmem:[%s728_s2 + $0x20] sm:$0xff] }
   0x5   :  { %492 = vmatpush3.bf16.xpose.msra.mxu0 %v117_v4 }
   0x6   :  { %67 = vperm.xlu1 %537, %v46_v8  }
   0x8   :  { %57 = vperm.xlu0 %536, %v44_v7  }
   0x9   :  { %14 = vsyncpa [#allocation3], 0  ;;  %v49_v13 = vld [vmem:[%s728_s2 + $0x30] sm:$0x3]  ;;  %v197_v14 = vld [vmem:[%s730_s4] sm:$0xff]  ;;  %vm223_vm1 = vcmask 408576  }
   0xa   :  { %77 = vperm.xlu1 %537, %v48_v12   ;;  %v541_v15 = vld [vmem:[%s727_s1 + $0x18] ss:$0 sps:$4 sm:$0x11]   ;;  %v198_v16 = vld [vmem:[%s730_s4 + $0x8] sm:$0xff]  ;;  %v199_v17 = vld [vmem:[%s730_s4 + $0x10] sm:$0xf] }
   0xb   :  { %v290_v18 = vld [vmem:[%s732_s6] sm:$0xff]  ;;  %v291_v19 = vld [vmem:[%s732_s6 + $0x8] sm:$0xff]  ;;  %v292_v20 = vld [vmem:[%s732_s6 + $0x10] sm:$0xf]  ;;  %vm230_vm2 = vcmask 1040384   ;;  %vm316_vm3 = vcmask 162816  }
   0xc   :  { %494 = vmatmul.mubr.msk.bf16.vlgmr.msra.gmra.mrb[0].mxu0 %vm103_vm0, %v539_v9  ;;  %72 = vperm.xlu0 %536, %v47_v11   ;;  %v381_v21 = vld [vmem:[%s734_s8] sm:$0x3]  ;;  %v543_v57 = vld [vmem:[%s729_s3 + $0x8] ss:$0 sps:$4 sm:$0x33]   ;;  %vm323_vm4 = vcmask 1041408  }
   0xd   :  { %497 = vmatprep.mubr.msk.bf16.mxu0 %vm103_vm0, %v540_v10  ;;  %v542_v22 = vld [vmem:[%s729_s3] sm:$0xff]   ;;  %v545_v11 = vld [vmem:[%s731_s5 + $0x8] ss:$0 sps:$4 sm:$0x33]   ;;  %v575_v12 = vmov 0.0   ;;  %vm576_vm5 = vmmov 0  }
   0xe   :  { %202 = vperm.xlu1 %537, %v197_v14   ;;  %509 = vmatprep.mubr.msk.bf16.mxu1 %vm223_vm1, %v542_v22  ;;  %v544_v58 = vld [vmem:[%s731_s5] sm:$0xff]   ;;  %s577_s27 = smov [#allocation2]   ;;  %vm439_vm6 = vcmask 58368  }
   0xf   :  { %s447_s28 = sshll.u32 %s577_s27, 4  ;;  %s448_s28 = int_to_ptr.vmem [resolvable:$true] %s447_s28 }
  0x10   :  { %82 = vperm.xlu0 %536, %v49_v13   ;;  %p555_p1 = scmp.lt.s32.totalorder %s448_s28, %s448_s28 }
  0x12   :  { %212 = vperm.xlu1 %537, %v199_v17  }
  0x14   :  { %498 = vmatmul.mubr.msk.bf16.gmra.mrb[4].mxu0 %vm103_vm0, %v541_v15  ;;  %207 = vperm.xlu0 %536, %v198_v16  }
  0x15   :  { %517 = vmatprep.mubr.msk.bf16.mxu0 %vm316_vm3, %v544_v58 }
  0x16   :  { %300 = vperm.xlu1 %537, %v291_v19  }
  0x18   :  { %295 = vperm.xlu0 %536, %v290_v18  }
  0x1a   :  { %384 = vperm.xlu1 %537, %v381_v21  }
  0x1c   :  { %305 = vperm.xlu0 %536, %v292_v20  }
  0x81   :  { %v63_v24 = vpop.permute.xlu1 %62 }
  0x83   :  { %v53_v23 = vpop.permute.xlu0 %52 }
  0x85   :  { %v68_v29 = vpop.permute.xlu1 %67 }
  0x87   :  { %v58_v25 = vpop.permute.xlu0 %57 }
  0x89   :  { %v78_v48 = vpop.permute.xlu1 %77 }
  0x8b   :  { %v73_v32 = vpop.permute.xlu0 %72 }
  0x8d   :  { %v203_v59 = vpop.permute.xlu1 %202 }
  0x8f   :  { %v83_v43 = vpop.permute.xlu0 %82 }
  0x91   :  { %v213_v61 = vpop.permute.xlu1 %212 }
  0x93   :  { %v208_v2 = vpop.permute.xlu0 %207 }
  0x95   :  { %v301_v20 = vpop.permute.xlu1 %300 }
  0x97   :  { %v296_v13 = vpop.permute.xlu0 %295 }
  0x9b   :  { %v306_v14 = vpop.permute.xlu0 %305 }
  0xdf   :  { %v495_v26 = vpop.f32.mrb[0].mxu0 }
  0xe0   :  { %v162_v27 = vadd.f32 %v495_v26, %v63_v24  ;;  %v153_v28 = vpop.f32.mrb[1].mxu0 }
  0xe1   :  { %v154_v30 = vadd.f32 %v153_v28, %v53_v23  ;;  %v496_v31 = vpop.f32.mrb[2].mxu0 }
  0xe2   :  { %v165_v33 = vadd.f32 %v496_v31, %v68_v29  ;;  %v156_v34 = vpop.f32.mrb[3].mxu0  ;;  %v185_v36 = vmax.f32 %v162_v27, 0.0  ;;  %v378_v29 = vld [vmem:[%s733_s7] sm:$0x1]  ;;  %s550_s7 = scalar_lea.vmem %s448_s28, 32 }
  0xe3   :  { %v157_v35 = vadd.f32 %v156_v34, %v58_v25  ;;  %v183_v38 = vmax.f32 %v154_v30, 0.0  ;;  %v385_v30 = vpop.permute.xlu1 %384  ;;  %p551_p0 = scmp.ne.s32.totalorder %s448_s28, %s550_s7  ;;  %p556_p2 = scmp.lt.s32.totalorder %s550_s7, %s550_s7 }
  0xe4   :  { %v186_v37 = vmax.f32 %v165_v33, 0.0 }
  0xe5   :  { %v184_v39 = vmax.f32 %v157_v35, 0.0  ;;  %p557_p3 = por %p556_p2, %p555_p1 }
  0xe6   :  { %v194_v40 = vpack.c.bf16 %v186_v37, %v185_v36 }
  0xe7   :  { %v499_v41 = vpop.f32.mrb[4].mxu0  ;;  %v193_v42 = vpack.c.bf16 %v184_v39, %v183_v38  ;;  %p558_p4 = pnand %p557_p3, %p551_p0 }
  0xe8   :  { %v169_v44 = vpop.f32.mrb[5].mxu0  ;;  %v178_v45 = vadd.f32 %v499_v41, %v83_v43 }
  0xe9   :  { %v170_v46 = vadd.f32 %v169_v44, %v73_v32  ;;  %v500_v47 = vpop.f32.mrb[6].mxu0  ;;  %501 = vmatprep.subr.bf16.mxu1 %v193_v42 }
  0xea   :  { %v172_v49 = vpop.f32.mrb[7].mxu0  ;;  %502 = vmatpush3.bf16.msra.mxu1 %v193_v42  ;;  %v189_v51 = vmax.f32 %v178_v45, 0.0 }
  0xeb   :  { %v173_v50 = vadd.f32 %v172_v49, %v78_v48  ;;  %503 = vmatprep.subr.bf16.mxu1 %v194_v40  ;;  %v187_v52 = vmax.f32 %v170_v46, 0.0 }
  0xec   :  { %v196_v55 = vpack.c.bf16 %v189_v51, %v189_v51 }
  0xed   :  { %v188_v53 = vmax.f32 %v173_v50, 0.0 }
  0xee   :  { %504 = vmatpush3.bf16.msra.mxu1 %v194_v40  ;;  %v232_v56 = vsel %vm230_vm2, %v196_v55, 0 }
  0xef   :  { %v195_v54 = vpack.c.bf16 %v188_v53, %v187_v52 }
  0xf1   :  { %505 = vmatprep.subr.bf16.mxu1 %v195_v54 }
  0xf2   :  { %506 = vmatpush3.bf16.msra.mxu1 %v195_v54 }
  0xf3   :  { %530 = vmatprep.subr.msk.bf16.mxu1 %vm230_vm2, %v196_v55 }
  0xf6   :  { %508 = vmatpush3.bf16.msra.mxu1 %v232_v56 }
  0xf7   :  { %521 = vmatprep.subr.bf16.mxu1 %v575_v12 }
  0xf9   :  { %510 = vmatmul.mubr.msk.bf16.vlgmr.msra.gmra.mrb[0].mxu1 %vm223_vm1, %v543_v57 }
  0xfa   :  { %525 = vmatprep.mubr.msk.bf16.mxu1 %vm576_vm5, %v575_v12 }
 0x1cc   :  { %v511_v60 = vpop.f32.mrb[0].mxu1 }
 0x1cd   :  { %v268_v62 = vpop.f32.mrb[1].mxu1  ;;  %v277_v63 = vadd.f32 %v511_v60, %v213_v61 }
 0x1ce   :  { %v269_v0 = vadd.f32 %v268_v62, %v203_v59  ;;  %v512_v1 = vpop.f32.mrb[2].mxu1 }
 0x1cf   :  { %v271_v3 = vpop.f32.mrb[3].mxu1  ;;  %v284_v5 = vmax.f32 %v277_v63, 0.0 }
 0x1d0   :  { %v272_v4 = vadd.f32 %v271_v3, %v208_v2  ;;  %v282_v6 = vmax.f32 %v269_v0, 0.0 }
 0x1d1   :  { %v289_v9 = vpack.c.bf16 %v284_v5, %v284_v5 }
 0x1d2   :  { %v283_v7 = vmax.f32 %v272_v4, 0.0 }
 0x1d3   :  { %v325_v10 = vsel %vm323_vm4, %v289_v9, 0 }
 0x1d4   :  { %v288_v8 = vpack.c.bf16 %v283_v7, %v282_v6 }
 0x1d6   :  { %513 = vmatprep.subr.bf16.mxu0 %v288_v8 }
 0x1d7   :  { %514 = vmatpush3.bf16.msra.mxu0 %v288_v8 }
 0x1d8   :  { %531 = vmatprep.subr.msk.bf16.mxu0 %vm323_vm4, %v289_v9 }
 0x1db   :  { %516 = vmatpush3.bf16.msra.mxu0 %v325_v10 }
 0x1de   :  { %518 = vmatmul.mubr.msk.bf16.vlgmr.msra.gmra.mrb[8].mxu0 %vm316_vm3, %v545_v11 }
 0x2b1   :  { %v519_v15 = vpop.f32.mrb[8].mxu0 }
 0x2b2   :  { %v370_v16 = vadd.f32 %v519_v15, %v306_v14  ;;  %v361_v17 = vpop.f32.mrb[9].mxu0 }
 0x2b3   :  { %v362_v18 = vadd.f32 %v361_v17, %v296_v13  ;;  %v520_v19 = vpop.f32.mrb[10].mxu0 }
 0x2b4   :  { %v364_v21 = vpop.f32.mrb[11].mxu0  ;;  %v377_v23 = vmax.f32 %v370_v16, 0.0 }
 0x2b5   :  { %v365_v22 = vadd.f32 %v364_v21, %v301_v20  ;;  %v375_v24 = vmax.f32 %v362_v18, 0.0 }
 0x2b6   :  { %v380_v27 = vpack.c.bf16 %v377_v23, %v377_v23 }
 0x2b7   :  { %v376_v25 = vmax.f32 %v365_v22, 0.0 }
 0x2b8   :  { %v391_v28 = vsel %vm323_vm4, %v380_v27, 0 }
 0x2b9   :  { %v379_v26 = vpack.c.bf16 %v376_v25, %v375_v24 }
 0x2bb   :  { %522 = vmatpush3.bf16.msra.mxu1 %v379_v26 }
 0x2bc   :  { %523 = vmatprep.subr.bf16.mxu1 %v575_v12 }
 0x2bf   :  { %524 = vmatpush3.bf16.msra.mxu1 %v391_v28 }
 0x2c2   :  { %526 = vmatmul.mubr.msk.bf16.vlgmr.msra.gmra.mrb[4].mxu1 %vm316_vm3, %v378_v29 }
 0x395   :  { %v427_v31 = vpop.f32.mrb[4].mxu1 }
 0x396   :  { %v428_v32 = vadd.f32 %v427_v31, %v385_v30  ;;  %v527_v33 = vpop.f32.mrb[5].mxu1 }
 0x397   :  { %v430_v34 = vpop.f32.mrb[6].mxu1 }
 0x398   :  { %v472_v35 = vmul.f32 -1.442695, %v428_v32  ;;  %v528_v36 = vpop.f32.mrb[7].mxu1 }
 0x39a   :  { %546 = vpow2.f32 %v472_v35 }
 0x3a4   :  { %v547_v37 = vpop.eup %546 }
 0x3a5   :  { %v436_v38 = vadd.f32 1.0, %v547_v37 }
 0x3a7   :  { %548 = vrcp.f32 %v436_v38 }
 0x3b1   :  { %v549_v39 = vpop.eup %548 }
 0x3b2   :  { %440 = vst.msk [vmem:[#allocation2] sm:$0x3] %vm439_vm6, %v549_v39 }
 0x3b3   :  { %561 = shalt.err (!%p558_p4)
}
 0x3b4   :  { %s562_s10 = scalar_lea.hbm %s735_s9, 32 }
 0x3b5   :  { %p563_p5 = scmp.ne.s32.totalorder %s735_s9, %s562_s10  ;;  %p566_p6 = scmp.lt.u32.totalorder %s562_s10, %s735_s9 }
 0x3b7   :  { %p568_p7 = pnand %p566_p6, %p563_p5 }
 0x3b9   :  { %571 = shalt.err (!%p568_p7)
}
 0x3ba   :  { %450 = dma.vmem_to_hbm [thread:$0]  %s448_s28, 32, %s735_s9, [#allocation3]  }
 0x3bb   :  { %572 = dma.done.wait [#allocation3], 32  }
 0x3bc   :  { %573 = vsyncadd [#allocation3], 4294967264 }
 0x3bd   :  { %454 = vsyncpa [#allocation3], 1 }

</bundles_post_ra>
